<compile_context>
chip_gen: v6e
topology: v6e:2x2x1
jax: 0.10.0
libtpu: 0.0.40
codegen_flags: <defaults>
</compile_context>

<pallas_src>
import jax
import jax.numpy as jnp
from jax.experimental import pallas as pl
from jax.experimental.pallas import tpu as pltpu


def _round_up(x, m):
    return ((x + m - 1) // m) * m


def _event_kernel(t_ref, s_ref, o_ref, wt_ref, ws_ref, wo_ref, we_ref, be_ref,
                  out_ref):
    # t/s/o_ref: (tm, H) streamed activation rows
    # w*_ref:    (H, H)  pre-transposed weights (VMEM-resident, grid-invariant)
    # be_ref:    (1, H)  bias (f32, VMEM-resident)
    # out_ref:   (tm, H)
    acc = jnp.dot(t_ref[...], wt_ref[...], preferred_element_type=jnp.float32)
    acc = acc + jnp.dot(s_ref[...], ws_ref[...], preferred_element_type=jnp.float32)
    acc = acc + jnp.dot(o_ref[...], wo_ref[...], preferred_element_type=jnp.float32)
    # Cast to the weight dtype so an opt-in bf16 path stays on the fast MXU
    # path; with f32 weights (default, exact-parity mode) this is a no-op.
    ev = jnp.dot(acc.astype(we_ref.dtype), we_ref[...],
                 preferred_element_type=jnp.float32)
    ev = ev + be_ref[...].astype(jnp.float32)
    out_ref[...] = jnp.tanh(ev).astype(out_ref.dtype)


def event_extraction_forward(trigger, subject, obj, params, *,
                             row_tile=512, compute_dtype=None):
    """Forward pass of EventExtractionModel.

    trigger/subject/obj: [..., hidden].  params: PyTorch-layout weights.
    compute_dtype=None keeps the input dtype (exact parity with the f32
    reference); compute_dtype=jnp.bfloat16 opts into the fast bf16 MXU path
    (small, documented accuracy tradeoff).
    """
    hidden = trigger.shape[-1]
    lead_shape = trigger.shape[:-1]
    n_rows = 1
    for d in lead_shape:
        n_rows *= d

    out_dtype = trigger.dtype
    act_dtype = trigger.dtype if compute_dtype is None else jnp.dtype(compute_dtype)

    # ---- wrapper-side layout prep (no in-kernel transposes / concat) --------
    t2 = trigger.reshape(n_rows, hidden).astype(act_dtype)
    s2 = subject.reshape(n_rows, hidden).astype(act_dtype)
    o2 = obj.reshape(n_rows, hidden).astype(act_dtype)
    w_t = params["wt"].T.astype(act_dtype)        # (H, H)
    w_s = params["ws"].T.astype(act_dtype)        # (H, H)
    w_o = params["wo"].T.astype(act_dtype)        # (H, H)
    w_e = params["we"].T.astype(act_dtype)        # (H, H)
    b_e = params["be"].reshape(1, hidden).astype(jnp.float32)

    # ---- row tiling ----------------------------------------------------------
    tm = min(row_tile, _round_up(n_rows, 8))
    # Keep enough grid steps to feed both v7x TensorCores and the DMA pipeline
    # (shrink tm for modest batches instead of producing a 1-2 step grid).
    min_steps = 8
    if pl.cdiv(n_rows, tm) < min_steps and n_rows >= min_steps * 8:
        tm = _round_up(pl.cdiv(n_rows, min_steps), 8)
    rows_padded = _round_up(n_rows, 8)            # partial last tile is fine
    pad = rows_padded - n_rows
    if pad:
        t2 = jnp.pad(t2, ((0, pad), (0, 0)))
        s2 = jnp.pad(s2, ((0, pad), (0, 0)))
        o2 = jnp.pad(o2, ((0, pad), (0, 0)))
    grid = (pl.cdiv(rows_padded, tm),)

    # ---- explicit VMEM budget (v5e scoped default is only 16 MiB) -----------
    a_item = jnp.dtype(act_dtype).itemsize
    o_item = jnp.dtype(out_dtype).itemsize
    h_lanes = _round_up(hidden, 128)
    h_sub = _round_up(hidden, 8)
    stream_bytes = 2 * tm * h_lanes * (3 * a_item + o_item)     # double-buffered
    weight_bytes = 4 * h_sub * h_lanes * a_item                 # single-buffered
    acc_bytes = 2 * tm * h_lanes * 4                            # f32 intermediates
    need = stream_bytes + weight_bytes + acc_bytes + 2 * h_lanes * 4
    vmem_limit = int(min(max(1.5 * need + (2 << 20), 32 << 20), 128 << 20))
    # TODO(synk): for very large hidden (f32 weights alone > VMEM, esp. v7x's
    # 64 MiB), add an output-column grid axis tiling the weights into (H, tn)
    # blocks; not needed at the sizes exercised here.

    cost = pl.CostEstimate(
        flops=8 * n_rows * hidden * hidden,                     # 4 matmuls
        transcendentals=n_rows * hidden,                        # tanh
        bytes_accessed=(3 * n_rows * hidden + 4 * hidden * hidden) * a_item
        + n_rows * hidden * o_item + hidden * 4,
    )

    def _make_call(weight_pipeline_mode):
        wkw = {} if weight_pipeline_mode is None else {
            "pipeline_mode": weight_pipeline_mode}
        in_specs = [
            pl.BlockSpec((tm, hidden), lambda i: (i, 0)),       # trigger rows
            pl.BlockSpec((tm, hidden), lambda i: (i, 0)),       # subject rows
            pl.BlockSpec((tm, hidden), lambda i: (i, 0)),       # object rows
            pl.BlockSpec((hidden, hidden), lambda i: (0, 0), **wkw),   # Wt.T
            pl.BlockSpec((hidden, hidden), lambda i: (0, 0), **wkw),   # Ws.T
            pl.BlockSpec((hidden, hidden), lambda i: (0, 0), **wkw),   # Wo.T
            pl.BlockSpec((hidden, hidden), lambda i: (0, 0), **wkw),   # We.T
            pl.BlockSpec((1, hidden), lambda i: (0, 0), **wkw),        # bias
        ]
        return pl.pallas_call(
            _event_kernel,
            out_shape=jax.ShapeDtypeStruct((rows_padded, hidden), out_dtype),
            grid=grid,
            in_specs=in_specs,
            out_specs=pl.BlockSpec((tm, hidden), lambda i: (i, 0)),
            compiler_params=pltpu.CompilerParams(
                dimension_semantics=("parallel",),
                vmem_limit_bytes=vmem_limit),
            cost_estimate=cost,
        )

    args = (t2, s2, o2, w_t, w_s, w_o, w_e, b_e)
    try:
        # Single-buffer the grid-invariant weights/bias (halves their VMEM).
        out = _make_call(pl.Buffered(1))(*args)
    except Exception:
        # Fallback for builds where Buffered(1) is not accepted on the outer
        # pallas_call pipeline; only costs doubled resident-weight VMEM.
        out = _make_call(None)(*args)

    return out[:n_rows].reshape(*lead_shape, hidden)


def init_params(key, hidden):
    ks = jax.random.split(key, 5)
    scale = 1.0 / jnp.sqrt(hidden)
    return {
        "wt": jax.random.uniform(ks[0], (hidden, hidden), jnp.float32, -scale, scale),
        "ws": jax.random.uniform(ks[1], (hidden, hidden), jnp.float32, -scale, scale),
        "wo": jax.random.uniform(ks[2], (hidden, hidden), jnp.float32, -scale, scale),
        "we": jax.random.uniform(ks[3], (hidden, hidden), jnp.float32, -scale, scale),
        "be": jax.random.uniform(ks[4], (hidden,), jnp.float32, -scale, scale),
    }


def reference_forward(trigger, subject, obj, params):
    # Pure-JAX reference mirroring the PyTorch module exactly.
    pre = (trigger @ params["wt"].T
           + subject @ params["ws"].T
           + obj @ params["wo"].T)
    return jnp.tanh(pre @ params["we"].T + params["be"])


if __name__ == "__main__":
    batch, seq, hidden = 2, 8, 32
    key = jax.random.PRNGKey(0)
    k_params, k_t, k_s, k_o = jax.random.split(key, 4)

    params = init_params(k_params, hidden)
    trigger = jax.random.normal(k_t, (batch, seq, hidden), jnp.float32)
    subject = jax.random.normal(k_s, (batch, seq, hidden), jnp.float32)
    obj = jax.random.normal(k_o, (batch, seq, hidden), jnp.float32)

    out = event_extraction_forward(trigger, subject, obj, params)
    out = jax.block_until_ready(out)

    ref = reference_forward(trigger, subject, obj, params)
    assert out.shape == (batch, seq, hidden)
    assert jnp.allclose(out, ref, atol=1e-5, rtol=1e-5), "mismatch vs reference"

    print("KERNEL_OK")
</pallas_src>

<mosaic_0001>
module attributes {stable_mosaic.version = 11 : i64} {
  func.func @_event_kernel(%arg0: i32, %arg1: memref<16x32xf32, #tpu.memory_space<vmem>>, %arg2: memref<16x32xf32, #tpu.memory_space<vmem>>, %arg3: memref<16x32xf32, #tpu.memory_space<vmem>>, %arg4: memref<32x32xf32, #tpu.memory_space<vmem>>, %arg5: memref<32x32xf32, #tpu.memory_space<vmem>>, %arg6: memref<32x32xf32, #tpu.memory_space<vmem>>, %arg7: memref<32x32xf32, #tpu.memory_space<vmem>>, %arg8: memref<1x32xf32, #tpu.memory_space<vmem>>, %arg9: memref<16x32xf32, #tpu.memory_space<vmem>>) attributes {dimension_semantics = [#tpu.dimension_semantics<parallel>], iteration_bounds = array<i64: 1>, scalar_prefetch = 0 : i64, scratch_operands = 0 : i64, tpu.core_type = #tpu.core_type<tc>, window_params = [{transform_indices = @transform_0, window_bounds = array<i64: 16, 32>}, {transform_indices = @transform_1, window_bounds = array<i64: 16, 32>}, {transform_indices = @transform_2, window_bounds = array<i64: 16, 32>}, {pipeline_mode = #tpu.pipeline_mode<synchronous>, transform_indices = @transform_3, window_bounds = array<i64: 32, 32>}, {pipeline_mode = #tpu.pipeline_mode<synchronous>, transform_indices = @transform_4, window_bounds = array<i64: 32, 32>}, {pipeline_mode = #tpu.pipeline_mode<synchronous>, transform_indices = @transform_5, window_bounds = array<i64: 32, 32>}, {pipeline_mode = #tpu.pipeline_mode<synchronous>, transform_indices = @transform_6, window_bounds = array<i64: 32, 32>}, {pipeline_mode = #tpu.pipeline_mode<synchronous>, transform_indices = @transform_7, window_bounds = array<i64: 1, 32>}, {transform_indices = @transform_8, window_bounds = array<i64: 16, 32>}]} {
    %c0 = arith.constant 0 : index
    %c0_0 = arith.constant 0 : index
    %0 = vector.load %arg1[%c0, %c0_0] : memref<16x32xf32, #tpu.memory_space<vmem>>, vector<16x32xf32>
    %c0_1 = arith.constant 0 : index
    %c0_2 = arith.constant 0 : index
    %1 = vector.load %arg4[%c0_1, %c0_2] : memref<32x32xf32, #tpu.memory_space<vmem>>, vector<32x32xf32>
    %cst = arith.constant dense<0.000000e+00> : vector<16x32xf32>
    %2 = tpu.matmul %0, %1, %cst {dimension_numbers = #tpu.dot_dimension_numbers<[1], [0], [0], [1], [0, 0, 1, 1], [], []>} : vector<16x32xf32>, vector<32x32xf32>, vector<16x32xf32> -> vector<16x32xf32>
    %c0_3 = arith.constant 0 : index
    %c0_4 = arith.constant 0 : index
    %3 = vector.load %arg2[%c0_3, %c0_4] : memref<16x32xf32, #tpu.memory_space<vmem>>, vector<16x32xf32>
    %c0_5 = arith.constant 0 : index
    %c0_6 = arith.constant 0 : index
    %4 = vector.load %arg5[%c0_5, %c0_6] : memref<32x32xf32, #tpu.memory_space<vmem>>, vector<32x32xf32>
    %cst_7 = arith.constant dense<0.000000e+00> : vector<16x32xf32>
    %5 = tpu.matmul %3, %4, %cst_7 {dimension_numbers = #tpu.dot_dimension_numbers<[1], [0], [0], [1], [0, 0, 1, 1], [], []>} : vector<16x32xf32>, vector<32x32xf32>, vector<16x32xf32> -> vector<16x32xf32>
    %6 = arith.addf %2, %5 : vector<16x32xf32>
    %c0_8 = arith.constant 0 : index
    %c0_9 = arith.constant 0 : index
    %7 = vector.load %arg3[%c0_8, %c0_9] : memref<16x32xf32, #tpu.memory_space<vmem>>, vector<16x32xf32>
    %c0_10 = arith.constant 0 : index
    %c0_11 = arith.constant 0 : index
    %8 = vector.load %arg6[%c0_10, %c0_11] : memref<32x32xf32, #tpu.memory_space<vmem>>, vector<32x32xf32>
    %cst_12 = arith.constant dense<0.000000e+00> : vector<16x32xf32>
    %9 = tpu.matmul %7, %8, %cst_12 {dimension_numbers = #tpu.dot_dimension_numbers<[1], [0], [0], [1], [0, 0, 1, 1], [], []>} : vector<16x32xf32>, vector<32x32xf32>, vector<16x32xf32> -> vector<16x32xf32>
    %10 = arith.addf %6, %9 : vector<16x32xf32>
    %c0_13 = arith.constant 0 : index
    %c0_14 = arith.constant 0 : index
    %11 = vector.load %arg7[%c0_13, %c0_14] : memref<32x32xf32, #tpu.memory_space<vmem>>, vector<32x32xf32>
    %cst_15 = arith.constant dense<0.000000e+00> : vector<16x32xf32>
    %12 = tpu.matmul %10, %11, %cst_15 {dimension_numbers = #tpu.dot_dimension_numbers<[1], [0], [0], [1], [0, 0, 1, 1], [], []>} : vector<16x32xf32>, vector<32x32xf32>, vector<16x32xf32> -> vector<16x32xf32>
    %c0_16 = arith.constant 0 : index
    %c0_17 = arith.constant 0 : index
    %13 = vector.load %arg8[%c0_16, %c0_17] : memref<1x32xf32, #tpu.memory_space<vmem>>, vector<1x32xf32>
    %14 = vector.broadcast %13 : vector<1x32xf32> to vector<16x32xf32>
    %15 = arith.addf %12, %14 : vector<16x32xf32>
    %16 = math.tanh %15 : vector<16x32xf32>
    %c0_18 = arith.constant 0 : index
    %c0_19 = arith.constant 0 : index
    %17 = vector.load %arg9[%c0_18, %c0_19] : memref<16x32xf32, #tpu.memory_space<vmem>>, vector<16x32xf32>
    tpu.vector_store %arg9[%c0_18, %c0_19], %16 {strides = array<i32>} : memref<16x32xf32, #tpu.memory_space<vmem>>, vector<16x32xf32>,
    return
  }
  func.func @transform_0(%arg0: i32) -> (i32, i32) {
    %c0_i32 = arith.constant 0 : i32
    %c0_i32_0 = arith.constant 0 : i32
    return %arg0, %c0_i32 : i32, i32
  }
  func.func @transform_1(%arg0: i32) -> (i32, i32) {
    %c0_i32 = arith.constant 0 : i32
    %c0_i32_0 = arith.constant 0 : i32
    return %arg0, %c0_i32 : i32, i32
  }
  func.func @transform_2(%arg0: i32) -> (i32, i32) {
    %c0_i32 = arith.constant 0 : i32
    %c0_i32_0 = arith.constant 0 : i32
    return %arg0, %c0_i32 : i32, i32
  }
  func.func @transform_3(%arg0: i32) -> (i32, i32) {
    %c0_i32 = arith.constant 0 : i32
    %c0_i32_0 = arith.constant 0 : i32
    %c0_i32_1 = arith.constant 0 : i32
    return %c0_i32, %c0_i32_0 : i32, i32
  }
  func.func @transform_4(%arg0: i32) -> (i32, i32) {
    %c0_i32 = arith.constant 0 : i32
    %c0_i32_0 = arith.constant 0 : i32
    %c0_i32_1 = arith.constant 0 : i32
    return %c0_i32, %c0_i32_0 : i32, i32
  }
  func.func @transform_5(%arg0: i32) -> (i32, i32) {
    %c0_i32 = arith.constant 0 : i32
    %c0_i32_0 = arith.constant 0 : i32
    %c0_i32_1 = arith.constant 0 : i32
    return %c0_i32, %c0_i32_0 : i32, i32
  }
  func.func @transform_6(%arg0: i32) -> (i32, i32) {
    %c0_i32 = arith.constant 0 : i32
    %c0_i32_0 = arith.constant 0 : i32
    %c0_i32_1 = arith.constant 0 : i32
    return %c0_i32, %c0_i32_0 : i32, i32
  }
  func.func @transform_7(%arg0: i32) -> (i32, i32) {
    %c0_i32 = arith.constant 0 : i32
    %c0_i32_0 = arith.constant 0 : i32
    %c0_i32_1 = arith.constant 0 : i32
    return %c0_i32, %c0_i32_0 : i32, i32
  }
  func.func @transform_8(%arg0: i32) -> (i32, i32) {
    %c0_i32 = arith.constant 0 : i32
    %c0_i32_0 = arith.constant 0 : i32
    return %arg0, %c0_i32 : i32, i32
  }
}

module attributes {stable_mosaic.version = 11 : i64} {
  func.func @_event_kernel(%arg0: i32, %arg1: memref<16x32xf32, #tpu.memory_space<vmem>>, %arg2: memref<16x32xf32, #tpu.memory_space<vmem>>, %arg3: memref<16x32xf32, #tpu.memory_space<vmem>>, %arg4: memref<32x32xf32, #tpu.memory_space<vmem>>, %arg5: memref<32x32xf32, #tpu.memory_space<vmem>>, %arg6: memref<32x32xf32, #tpu.memory_space<vmem>>, %arg7: memref<32x32xf32, #tpu.memory_space<vmem>>, %arg8: memref<1x32xf32, #tpu.memory_space<vmem>>, %arg9: memref<16x32xf32, #tpu.memory_space<vmem>>) attributes {dimension_semantics = [#tpu.dimension_semantics<parallel>], iteration_bounds = array<i64: 1>, scalar_prefetch = 0 : i64, scratch_operands = 0 : i64, tpu.core_type = #tpu.core_type<tc>, window_params = [{transform_indices = @transform_0, window_bounds = array<i64: 16, 32>}, {transform_indices = @transform_1, window_bounds = array<i64: 16, 32>}, {transform_indices = @transform_2, window_bounds = array<i64: 16, 32>}, {pipeline_mode = #tpu.pipeline_mode<synchronous>, transform_indices = @transform_3, window_bounds = array<i64: 32, 32>}, {pipeline_mode = #tpu.pipeline_mode<synchronous>, transform_indices = @transform_4, window_bounds = array<i64: 32, 32>}, {pipeline_mode = #tpu.pipeline_mode<synchronous>, transform_indices = @transform_5, window_bounds = array<i64: 32, 32>}, {pipeline_mode = #tpu.pipeline_mode<synchronous>, transform_indices = @transform_6, window_bounds = array<i64: 32, 32>}, {pipeline_mode = #tpu.pipeline_mode<synchronous>, transform_indices = @transform_7, window_bounds = array<i64: 1, 32>}, {transform_indices = @transform_8, window_bounds = array<i64: 16, 32>}]} {
    %c0 = arith.constant 0 : index
    %c0_0 = arith.constant 0 : index
    %0 = vector.load %arg1[%c0, %c0_0] : memref<16x32xf32, #tpu.memory_space<vmem>>, vector<16x32xf32>
    %c0_1 = arith.constant 0 : index
    %c0_2 = arith.constant 0 : index
    %1 = vector.load %arg4[%c0_1, %c0_2] : memref<32x32xf32, #tpu.memory_space<vmem>>, vector<32x32xf32>
    %cst = arith.constant dense<0.000000e+00> : vector<16x32xf32>
    %2 = tpu.matmul %0, %1, %cst {dimension_numbers = #tpu.dot_dimension_numbers<[1], [0], [0], [1], [0, 0, 1, 1], [], []>} : vector<16x32xf32>, vector<32x32xf32>, vector<16x32xf32> -> vector<16x32xf32>
    %c0_3 = arith.constant 0 : index
    %c0_4 = arith.constant 0 : index
    %3 = vector.load %arg2[%c0_3, %c0_4] : memref<16x32xf32, #tpu.memory_space<vmem>>, vector<16x32xf32>
    %c0_5 = arith.constant 0 : index
    %c0_6 = arith.constant 0 : index
    %4 = vector.load %arg5[%c0_5, %c0_6] : memref<32x32xf32, #tpu.memory_space<vmem>>, vector<32x32xf32>
    %cst_7 = arith.constant dense<0.000000e+00> : vector<16x32xf32>
    %5 = tpu.matmul %3, %4, %cst_7 {dimension_numbers = #tpu.dot_dimension_numbers<[1], [0], [0], [1], [0, 0, 1, 1], [], []>} : vector<16x32xf32>, vector<32x32xf32>, vector<16x32xf32> -> vector<16x32xf32>
    %6 = arith.addf %2, %5 : vector<16x32xf32>
    %c0_8 = arith.constant 0 : index
    %c0_9 = arith.constant 0 : index
    %7 = vector.load %arg3[%c0_8, %c0_9] : memref<16x32xf32, #tpu.memory_space<vmem>>, vector<16x32xf32>
    %c0_10 = arith.constant 0 : index
    %c0_11 = arith.constant 0 : index
    %8 = vector.load %arg6[%c0_10, %c0_11] : memref<32x32xf32, #tpu.memory_space<vmem>>, vector<32x32xf32>
    %cst_12 = arith.constant dense<0.000000e+00> : vector<16x32xf32>
    %9 = tpu.matmul %7, %8, %cst_12 {dimension_numbers = #tpu.dot_dimension_numbers<[1], [0], [0], [1], [0, 0, 1, 1], [], []>} : vector<16x32xf32>, vector<32x32xf32>, vector<16x32xf32> -> vector<16x32xf32>
    %10 = arith.addf %6, %9 : vector<16x32xf32>
    %c0_13 = arith.constant 0 : index
    %c0_14 = arith.constant 0 : index
    %11 = vector.load %arg7[%c0_13, %c0_14] : memref<32x32xf32, #tpu.memory_space<vmem>>, vector<32x32xf32>
    %cst_15 = arith.constant dense<0.000000e+00> : vector<16x32xf32>
    %12 = tpu.matmul %10, %11, %cst_15 {dimension_numbers = #tpu.dot_dimension_numbers<[1], [0], [0], [1], [0, 0, 1, 1], [], []>} : vector<16x32xf32>, vector<32x32xf32>, vector<16x32xf32> -> vector<16x32xf32>
    %c0_16 = arith.constant 0 : index
    %c0_17 = arith.constant 0 : index
    %13 = vector.load %arg8[%c0_16, %c0_17] : memref<1x32xf32, #tpu.memory_space<vmem>>, vector<1x32xf32>
    %14 = vector.broadcast %13 : vector<1x32xf32> to vector<16x32xf32>
    %15 = arith.addf %12, %14 : vector<16x32xf32>
    %16 = math.tanh %15 : vector<16x32xf32>
    %c0_18 = arith.constant 0 : index
    %c0_19 = arith.constant 0 : index
    %17 = vector.load %arg9[%c0_18, %c0_19] : memref<16x32xf32, #tpu.memory_space<vmem>>, vector<16x32xf32>
    tpu.vector_store %arg9[%c0_18, %c0_19], %16 {strides = array<i32>} : memref<16x32xf32, #tpu.memory_space<vmem>>, vector<16x32xf32>,
    return
  }
  func.func @transform_0(%arg0: i32) -> (i32, i32) {
    %c0_i32 = arith.constant 0 : i32
    %c0_i32_0 = arith.constant 0 : i32
    return %arg0, %c0_i32 : i32, i32
  }
  func.func @transform_1(%arg0: i32) -> (i32, i32) {
    %c0_i32 = arith.constant 0 : i32
    %c0_i32_0 = arith.constant 0 : i32
    return %arg0, %c0_i32 : i32, i32
  }
  func.func @transform_2(%arg0: i32) -> (i32, i32) {
    %c0_i32 = arith.constant 0 : i32
    %c0_i32_0 = arith.constant 0 : i32
    return %arg0, %c0_i32 : i32, i32
  }
  func.func @transform_3(%arg0: i32) -> (i32, i32) {
    %c0_i32 = arith.constant 0 : i32
    %c0_i32_0 = arith.constant 0 : i32
    %c0_i32_1 = arith.constant 0 : i32
    return %c0_i32, %c0_i32_0 : i32, i32
  }
  func.func @transform_4(%arg0: i32) -> (i32, i32) {
    %c0_i32 = arith.constant 0 : i32
    %c0_i32_0 = arith.constant 0 : i32
    %c0_i32_1 = arith.constant 0 : i32
    return %c0_i32, %c0_i32_0 : i32, i32
  }
  func.func @transform_5(%arg0: i32) -> (i32, i32) {
    %c0_i32 = arith.constant 0 : i32
    %c0_i32_0 = arith.constant 0 : i32
    %c0_i32_1 = arith.constant 0 : i32
    return %c0_i32, %c0_i32_0 : i32, i32
  }
  func.func @transform_6(%arg0: i32) -> (i32, i32) {
    %c0_i32 = arith.constant 0 : i32
    %c0_i32_0 = arith.constant 0 : i32
    %c0_i32_1 = arith.constant 0 : i32
    return %c0_i32, %c0_i32_0 : i32, i32
  }
  func.func @transform_7(%arg0: i32) -> (i32, i32) {
    %c0_i32 = arith.constant 0 : i32
    %c0_i32_0 = arith.constant 0 : i32
    %c0_i32_1 = arith.constant 0 : i32
    return %c0_i32, %c0_i32_0 : i32, i32
  }
  func.func @transform_8(%arg0: i32) -> (i32, i32) {
    %c0_i32 = arith.constant 0 : i32
    %c0_i32_0 = arith.constant 0 : i32
    return %arg0, %c0_i32 : i32, i32
  }
}

</mosaic_0001>

<bundles_post_ra>
// kernel: tpu_custom_call.1
= control target key start
LH: loop header
LB: loop body
LE: loop exit
PB: predicated region body
PF: predicated region fallthrough
CT: control target
= control target key end

     0   :  { %13 = vsyncpa [#allocation3], 0  ;;  %s882_s0 = inlined_call_operand.hbm [shape: f32[16,32], index: 0, kind: input, shape index: {}]   ;;  %s883_s1 = inlined_call_operand.hbm [shape: f32[16,32], index: 1, kind: input, shape index: {}]   ;;  %s884_s2 = inlined_call_operand.hbm [shape: f32[16,32], index: 2, kind: input, shape index: {}]   ;;  %s885_s3 = inlined_call_operand.hbm [shape: f32[32,32], index: 3, kind: input, shape index: {}]   ;;  %s886_s4 = inlined_call_operand.hbm [shape: f32[32,32], index: 4, kind: input, shape index: {}]   ;;  %s887_s5 = inlined_call_operand.hbm [shape: f32[32,32], index: 5, kind: input, shape index: {}]   ;;  %s888_s6 = inlined_call_operand.hbm [shape: f32[32,32], index: 6, kind: input, shape index: {}]   ;;  %s889_s7 = inlined_call_operand.vmem [shape: f32[1,32], index: 7, kind: input, shape index: {}]   ;;  %s890_s8 = inlined_call_operand.hbm [shape: f32[16,32], index: 8, kind: output, shape index: {}]  }
   0x1   :  { %14 = vsyncpa [#allocation6], 0 }
   0x2   :  { %15 = vsyncpa [#allocation9], 0 }
   0x3   :  { %16 = vsyncpa [#allocation12], 0 }
   0x4   :  { %17 = vsyncpa [#allocation4], 0  ;;  %s766_s27 = smov [#allocation5]   ;;  %s767_s29 = smov [#allocation8]  }
   0x5   :  { %s35_s28 = sshll.u32 %s766_s27, 4  ;;  %s59_s30 = sshll.u32 %s767_s29, 4  ;;  %s36_s28 = int_to_ptr.vmem [resolvable:$true] %s35_s28  ;;  %s60_s30 = int_to_ptr.vmem [resolvable:$true] %s59_s30 }
   0x6   :  { %s604_s9 = scalar_lea.vmem %s36_s28, 256  ;;  %p609_p1 = scmp.lt.s32.totalorder %s36_s28, %s36_s28 }
   0x7   :  { %p605_p0 = scmp.ne.s32.totalorder %s36_s28, %s604_s9  ;;  %p610_p2 = scmp.lt.s32.totalorder %s604_s9, %s604_s9 }
   0x9   :  { %p611_p3 = por %p610_p2, %p609_p1 }
   0xb   :  { %p612_p4 = pnand %p611_p3, %p605_p0 }
   0xd   :  { %615 = shalt.err (!%p612_p4)
}
   0xe   :  { %s768_s10 = smov 128   ;;  %s769_s11 = smov 8  }
   0xf   :  { %41 = dma.hbm_to_vmem [thread:$0]  %s883_s1, 256, %s36_s28, [#allocation6], %s768_s10, %s768_s10, %s769_s11  }
  0x10   :  { %s624_s14 = scalar_lea.vmem %s60_s30, 512  ;;  %p629_p6 = scmp.lt.s32.totalorder %s60_s30, %s60_s30 }
  0x11   :  { %p625_p5 = scmp.ne.s32.totalorder %s60_s30, %s624_s14  ;;  %p630_p7 = scmp.lt.s32.totalorder %s624_s14, %s624_s14 }
  0x13   :  { %p631_p8 = por %p630_p7, %p629_p6 }
  0x15   :  { %p632_p9 = pnand %p631_p8, %p625_p5 }
  0x17   :  { %635 = shalt.err (!%p632_p9)
}
  0x18   :  { %65 = dma.hbm_to_vmem [thread:$0]  %s885_s3, 512, %s60_s30, [#allocation9], %s768_s10, %s768_s10, %s769_s11  }
  0x19   :  { %s770_s17 = smov [#allocation11]   ;;  %s771_s19 = smov [#allocation2]  }
  0x1a   :  { %s83_s18 = sshll.u32 %s770_s17, 4  ;;  %s23_s20 = sshll.u32 %s771_s19, 4  ;;  %s84_s18 = int_to_ptr.vmem [resolvable:$true] %s83_s18  ;;  %s24_s20 = int_to_ptr.vmem [resolvable:$true] %s23_s20 }
  0x1b   :  { %s644_s1 = scalar_lea.vmem %s84_s18, 512  ;;  %p649_p11 = scmp.lt.s32.totalorder %s84_s18, %s84_s18 }
  0x1c   :  { %p645_p10 = scmp.ne.s32.totalorder %s84_s18, %s644_s1  ;;  %p650_p12 = scmp.lt.s32.totalorder %s644_s1, %s644_s1 }
  0x1e   :  { %p651_p13 = por %p650_p12, %p649_p11 }
  0x20   :  { %p652_p0 = pnand %p651_p13, %p645_p10 }
  0x22   :  { %655 = shalt.err (!%p652_p0)
}
  0x23   :  { %89 = dma.hbm_to_vmem [thread:$0]  %s887_s5, 512, %s84_s18, [#allocation12], %s768_s10, %s768_s10, %s769_s11  }
  0x24   :  { %s664_s3 = scalar_lea.vmem %s24_s20, 256  ;;  %p669_p2 = scmp.lt.s32.totalorder %s24_s20, %s24_s20 }
  0x25   :  { %p665_p1 = scmp.ne.s32.totalorder %s24_s20, %s664_s3  ;;  %p670_p3 = scmp.lt.s32.totalorder %s664_s3, %s664_s3 }
  0x27   :  { %p671_p4 = por %p670_p3, %p669_p2 }
  0x29   :  { %p672_p5 = pnand %p671_p4, %p665_p1 }
  0x2b   :  { %675 = shalt.err (!%p672_p5)
}
  0x2c   :  { %29 = dma.hbm_to_vmem [thread:$0]  %s882_s0, 256, %s24_s20, [#allocation3], %s768_s10, %s768_s10, %s769_s11  }
  0x2d   :  { %s772_s25 = smov [#allocation7]   ;;  %s773_s27 = smov [#allocation10]  }
  0x2e   :  { %s47_s26 = sshll.u32 %s772_s25, 4  ;;  %s71_s28 = sshll.u32 %s773_s27, 4  ;;  %s48_s26 = int_to_ptr.vmem [resolvable:$true] %s47_s26  ;;  %s72_s28 = int_to_ptr.vmem [resolvable:$true] %s71_s28 }
  0x2f   :  { %s684_s5 = scalar_lea.vmem %s48_s26, 256  ;;  %p689_p7 = scmp.lt.s32.totalorder %s48_s26, %s48_s26 }
  0x30   :  { %p685_p6 = scmp.ne.s32.totalorder %s48_s26, %s684_s5  ;;  %p690_p8 = scmp.lt.s32.totalorder %s684_s5, %s684_s5 }
  0x32   :  { %p691_p9 = por %p690_p8, %p689_p7 }
  0x34   :  { %p692_p10 = pnand %p691_p9, %p685_p6 }
  0x36   :  { %695 = shalt.err (!%p692_p10)
}
  0x37   :  { %53 = dma.hbm_to_vmem [thread:$0]  %s884_s2, 256, %s48_s26, [#allocation6], %s768_s10, %s768_s10, %s769_s11  }
  0x38   :  { %s704_s0 = scalar_lea.vmem %s72_s28, 512  ;;  %p709_p12 = scmp.lt.s32.totalorder %s72_s28, %s72_s28 }
  0x39   :  { %p705_p11 = scmp.ne.s32.totalorder %s72_s28, %s704_s0  ;;  %p710_p13 = scmp.lt.s32.totalorder %s704_s0, %s704_s0 }
  0x3b   :  { %p711_p0 = por %p710_p13, %p709_p12 }
  0x3d   :  { %p712_p1 = pnand %p711_p0, %p705_p11 }
  0x3f   :  { %715 = shalt.err (!%p712_p1)
}
  0x40   :  { %77 = dma.hbm_to_vmem [thread:$0]  %s886_s4, 512, %s72_s28, [#allocation9], %s768_s10, %s768_s10, %s769_s11  }
  0x41   :  { %s774_s13 = smov [#allocation13]  }
  0x42   :  { %s95_s14 = sshll.u32 %s774_s13, 4  ;;  %s96_s14 = int_to_ptr.vmem [resolvable:$true] %s95_s14 }
  0x43   :  { %s724_s15 = scalar_lea.vmem %s96_s14, 512  ;;  %p729_p3 = scmp.lt.s32.totalorder %s96_s14, %s96_s14 }
  0x44   :  { %p725_p2 = scmp.ne.s32.totalorder %s96_s14, %s724_s15  ;;  %p730_p4 = scmp.lt.s32.totalorder %s724_s15, %s724_s15 }
  0x46   :  { %p731_p5 = por %p730_p4, %p729_p3 }
  0x48   :  { %p732_p6 = pnand %p731_p5, %p725_p2 }
  0x4a   :  { %735 = shalt.err (!%p732_p6)
}
  0x4b   :  { %101 = dma.hbm_to_vmem [thread:$0]  %s888_s6, 512, %s96_s14, [#allocation12], %s768_s10, %s768_s10, %s769_s11  }
  0x4c   :  { %756 = dma.done.wait [#allocation3], 256  }
  0x4d   :  { %757 = vsyncadd [#allocation3], 4294967040 }
  0x4e   :  { %758 = dma.done.wait [#allocation6], 512  }
  0x4f   :  { %759 = vsyncadd [#allocation6], 4294966784 }
  0x50   :  { %760 = dma.done.wait [#allocation9], 1024  }
  0x51   :  { %761 = vsyncadd [#allocation9], 4294966272 }
  0x52   :  { %762 = dma.done.wait [#allocation12], 1024  }
  0x53   :  { %763 = vsyncadd [#allocation12], 4294966272  ;;  %v136_v0 = vld [vmem:[#allocation10 + $0x18] sm:$0xff]  ;;  %v135_v2 = vld [vmem:[#allocation10 + $0x10] sm:$0xff]  ;;  %vm137_vm0 = vcmask 261120   ;;  %s775_s17 = smov [#allocation14]  }
  0x54   :  { %v130_v1 = vld [vmem:[#allocation8 + $0x18] sm:$0xff]  ;;  %538 = vmatprep.subr.mxu0 %v136_v0  ;;  %v129_v3 = vld [vmem:[#allocation8 + $0x10] sm:$0xff]  ;;  %v134_v4 = vld [vmem:[#allocation10 + $0x8] sm:$0xff]  ;;  %s490_s18 = sshll.u32 %s775_s17, 4  ;;  %s491_s18 = int_to_ptr.vmem [resolvable:$true] %s490_s18 }
  0x55   :  { %549 = vmatprep.subr.mxu1 %v130_v1  ;;  %539 = vmatpush3.msra.mxu0 %v136_v0  ;;  %v128_v5 = vld [vmem:[#allocation8 + $0x8] sm:$0xff]  ;;  %v133_v6 = vld [vmem:[#allocation10] sm:$0xff]  ;;  %v125_v9 = vld [vmem:[#allocation2] sm:$0xff]  ;;  %s736_s19 = scalar_lea.vmem %s491_s18, 256  ;;  %p741_p8 = scmp.lt.s32.totalorder %s491_s18, %s491_s18 }
  0x56   :  { %550 = vmatpush3.msra.mxu1 %v130_v1  ;;  %540 = vmatprep.subr.mxu0 %v135_v2  ;;  %v127_v7 = vld [vmem:[#allocation8] sm:$0xff]  ;;  %v132_v10 = vld [vmem:[#allocation5 + $0x8] sm:$0xff]  ;;  %v126_v11 = vld [vmem:[#allocation2 + $0x8] sm:$0xff]  ;;  %p737_p7 = scmp.ne.s32.totalorder %s491_s18, %s736_s19  ;;  %p742_p9 = scmp.lt.s32.totalorder %s736_s19, %s736_s19 }
  0x57   :  { %551 = vmatprep.subr.mxu1 %v129_v3  ;;  %541 = vmatpush3.msra.mxu0 %v135_v2  ;;  %v131_v8 = vld [vmem:[#allocation5] sm:$0xff]  ;;  %v305_v12 = vld [vmem:[#allocation11 + $0x18] sm:$0xff]  ;;  %v300_v13 = vld [vmem:[#allocation7] sm:$0xff] }
  0x58   :  { %552 = vmatpush3.msra.mxu1 %v129_v3  ;;  %542 = vmatprep.subr.mxu0 %v134_v4  ;;  %v304_v14 = vld [vmem:[#allocation11 + $0x10] sm:$0xff]  ;;  %v303_v15 = vld [vmem:[#allocation11 + $0x8] sm:$0xff]  ;;  %v302_v16 = vld [vmem:[#allocation11] sm:$0xff]  ;;  %p743_p10 = por %p742_p9, %p741_p8 }
  0x59   :  { %553 = vmatprep.subr.mxu1 %v128_v5  ;;  %543 = vmatpush3.msra.mxu0 %v134_v4  ;;  %v301_v17 = vld [vmem:[#allocation7 + $0x8] sm:$0xff]  ;;  %v391_v19 = vld [vmem:[#allocation13 + $0x10] sm:$0xff]  ;;  %v390_v20 = vld [vmem:[#allocation13 + $0x8] sm:$0xff] }
  0x5a   :  { %554 = vmatpush3.msra.mxu1 %v128_v5  ;;  %544 = vmatprep.subr.mxu0 %v133_v6  ;;  %v392_v18 = vld [vmem:[#allocation13 + $0x18] sm:$0xff]  ;;  %v389_v21 = vld [vmem:[#allocation13] sm:$0xff]  ;;  %v511_v32 = vld [vmem:[%s889_s7] ss:$0 sm:$0xff]  ;;  %p744_p11 = pnand %p743_p10, %p737_p7 }
  0x5b   :  { %555 = vmatprep.subr.mxu1 %v127_v7  ;;  %545 = vmatpush3.msra.mxu0 %v133_v6 }
  0x5c   :  { %546 = vmatprep.mubr.msk.f32.mxu0 %vm137_vm0, %v131_v8  ;;  %556 = vmatpush3.msra.mxu1 %v127_v7 }
  0x5d   :  { %557 = vmatprep.mubr.msk.f32.mxu1 %vm137_vm0, %v125_v9  ;;  %547 = vmatmul.mubr.msk.f32.vlgmr.msra.gmra.mxu0 %vm137_vm0, %v132_v10 }
  0x5e   :  { %558 = vmatmul.mubr.msk.f32.vlgmr.msra.gmra.mxu1 %vm137_vm0, %v126_v11  ;;  %560 = vmatprep.subr.mxu0 %v305_v12 }
  0x5f   :  { %568 = vmatprep.mubr.msk.f32.mxu0 %vm137_vm0, %v300_v13  ;;  %561 = vmatpush3.msra.mxu0 %v305_v12 }
  0x60   :  { %562 = vmatprep.subr.mxu0 %v304_v14  ;;  %571 = vmatprep.subr.mxu1 %v392_v18 }
  0x61   :  { %563 = vmatpush3.msra.mxu0 %v304_v14  ;;  %572 = vmatpush3.msra.mxu1 %v392_v18 }
  0x62   :  { %564 = vmatprep.subr.mxu0 %v303_v15  ;;  %573 = vmatprep.subr.mxu1 %v391_v19 }
  0x63   :  { %565 = vmatpush3.msra.mxu0 %v303_v15  ;;  %574 = vmatpush3.msra.mxu1 %v391_v19 }
  0x64   :  { %566 = vmatprep.subr.mxu0 %v302_v16  ;;  %575 = vmatprep.subr.mxu1 %v390_v20 }
  0x65   :  { %567 = vmatpush3.msra.mxu0 %v302_v16  ;;  %576 = vmatpush3.msra.mxu1 %v390_v20 }
  0x66   :  { %569 = vmatmul.mubr.msk.f32.vlgmr.msra.gmra.mxu0 %vm137_vm0, %v301_v17  ;;  %577 = vmatprep.subr.mxu1 %v389_v21 }
  0x67   :  { %578 = vmatpush3.msra.mxu1 %v389_v21 }
 0x11d   :  { %v548_v22 = vpop.f32.mrf.mxu0 }
 0x11e   :  { %v559_v23 = vpop.f32.mrf.mxu1 }
 0x11f   :  { %v210_v24 = vpop.f32.mrf.mxu0  ;;  %v297_v28 = vadd.f32 %v559_v23, %v548_v22 }
 0x120   :  { %v291_v25 = vpop.f32.mrf.mxu1 }
 0x121   :  { %v292_v27 = vadd.f32 %v291_v25, %v210_v24 }
 0x126   :  { %v570_v26 = vpop.f32.mrf.mxu0 }
 0x127   :  { %v388_v31 = vadd.f32 %v570_v26, %v297_v28 }
 0x128   :  { %v378_v29 = vpop.f32.mrf.mxu0 }
 0x129   :  { %v387_v30 = vadd.f32 %v378_v29, %v292_v27 }
 0x12b   :  { %579 = vmatprep.mubr.msk.f32.mxu1 %vm137_vm0, %v387_v30 }
 0x12c   :  { %580 = vmatmul.mubr.msk.f32.vlgmr.msra.gmra.mxu1 %vm137_vm0, %v388_v31 }
 0x1ec   :  { %v581_v33 = vpop.f32.mrf.mxu1 }
 0x1ed   :  { %v478_v34 = vadd.f32 %v581_v33, %v511_v32 }
 0x1ee   :  { %v472_v35 = vpop.f32.mrf.mxu1 }
 0x1ef   :  { %592 = vtanh.f32 %v478_v34  ;;  %v473_v36 = vadd.f32 %v511_v32, %v472_v35 }
 0x1f1   :  { %594 = vtanh.f32 %v473_v36 }
 0x1fc   :  { %v593_v37 = vpop.eup %592 }
 0x1fd   :  { %484 = vst.msk [vmem:[#allocation14 + $0x8] sm:$0xff] %vm137_vm0, %v593_v37 }
 0x1fe   :  { %v595_v38 = vpop.eup %594 }
 0x1ff   :  { %483 = vst.msk [vmem:[#allocation14] sm:$0xff] %vm137_vm0, %v595_v38 }
 0x200   :  { %747 = shalt.err (!%p744_p11)
}
 0x201   :  { %496 = dma.vmem_to_hbm [thread:$0]  %s491_s18, 256, %s890_s8, [#allocation4], %s768_s10, %s768_s10, %s769_s11  }
 0x202   :  { %764 = dma.done.wait [#allocation4], 256  }
 0x203   :  { %765 = vsyncadd [#allocation4], 4294967040 }
 0x204   :  { %500 = vsyncpa [#allocation3], 1 }
 0x205   :  { %501 = vsyncpa [#allocation6], 1 }
 0x206   :  { %502 = vsyncpa [#allocation9], 1 }
 0x207   :  { %503 = vsyncpa [#allocation12], 1 }
 0x208   :  { %504 = vsyncpa [#allocation4], 1 }

// kernel: tpu_custom_call.1
= control target key start
LH: loop header
LB: loop body
LE: loop exit
PB: predicated region body
PF: predicated region fallthrough
CT: control target
= control target key end

     0   :  { %13 = vsyncpa [#allocation3], 0  ;;  %s882_s0 = inlined_call_operand.hbm [shape: f32[16,32], index: 0, kind: input, shape index: {}]   ;;  %s883_s1 = inlined_call_operand.hbm [shape: f32[16,32], index: 1, kind: input, shape index: {}]   ;;  %s884_s2 = inlined_call_operand.hbm [shape: f32[16,32], index: 2, kind: input, shape index: {}]   ;;  %s885_s3 = inlined_call_operand.hbm [shape: f32[32,32], index: 3, kind: input, shape index: {}]   ;;  %s886_s4 = inlined_call_operand.hbm [shape: f32[32,32], index: 4, kind: input, shape index: {}]   ;;  %s887_s5 = inlined_call_operand.hbm [shape: f32[32,32], index: 5, kind: input, shape index: {}]   ;;  %s888_s6 = inlined_call_operand.hbm [shape: f32[32,32], index: 6, kind: input, shape index: {}]   ;;  %s889_s7 = inlined_call_operand.vmem [shape: f32[1,32], index: 7, kind: input, shape index: {}]   ;;  %s890_s8 = inlined_call_operand.hbm [shape: f32[16,32], index: 8, kind: output, shape index: {}]  }
   0x1   :  { %14 = vsyncpa [#allocation6], 0 }
   0x2   :  { %15 = vsyncpa [#allocation9], 0 }
   0x3   :  { %16 = vsyncpa [#allocation12], 0 }
   0x4   :  { %17 = vsyncpa [#allocation4], 0  ;;  %s766_s27 = smov [#allocation5]   ;;  %s767_s29 = smov [#allocation8]  }
   0x5   :  { %s35_s28 = sshll.u32 %s766_s27, 4  ;;  %s59_s30 = sshll.u32 %s767_s29, 4  ;;  %s36_s28 = int_to_ptr.vmem [resolvable:$true] %s35_s28  ;;  %s60_s30 = int_to_ptr.vmem [resolvable:$true] %s59_s30 }
   0x6   :  { %s604_s9 = scalar_lea.vmem %s36_s28, 256  ;;  %p609_p1 = scmp.lt.s32.totalorder %s36_s28, %s36_s28 }
   0x7   :  { %p605_p0 = scmp.ne.s32.totalorder %s36_s28, %s604_s9  ;;  %p610_p2 = scmp.lt.s32.totalorder %s604_s9, %s604_s9 }
   0x9   :  { %p611_p3 = por %p610_p2, %p609_p1 }
   0xb   :  { %p612_p4 = pnand %p611_p3, %p605_p0 }
   0xd   :  { %615 = shalt.err (!%p612_p4)
}
   0xe   :  { %s768_s10 = smov 128   ;;  %s769_s11 = smov 8  }
   0xf   :  { %41 = dma.hbm_to_vmem [thread:$0]  %s883_s1, 256, %s36_s28, [#allocation6], %s768_s10, %s768_s10, %s769_s11  }
  0x10   :  { %s624_s14 = scalar_lea.vmem %s60_s30, 512  ;;  %p629_p6 = scmp.lt.s32.totalorder %s60_s30, %s60_s30 }
  0x11   :  { %p625_p5 = scmp.ne.s32.totalorder %s60_s30, %s624_s14  ;;  %p630_p7 = scmp.lt.s32.totalorder %s624_s14, %s624_s14 }
  0x13   :  { %p631_p8 = por %p630_p7, %p629_p6 }
  0x15   :  { %p632_p9 = pnand %p631_p8, %p625_p5 }
  0x17   :  { %635 = shalt.err (!%p632_p9)
}
  0x18   :  { %65 = dma.hbm_to_vmem [thread:$0]  %s885_s3, 512, %s60_s30, [#allocation9], %s768_s10, %s768_s10, %s769_s11  }
  0x19   :  { %s770_s17 = smov [#allocation11]   ;;  %s771_s19 = smov [#allocation2]  }
  0x1a   :  { %s83_s18 = sshll.u32 %s770_s17, 4  ;;  %s23_s20 = sshll.u32 %s771_s19, 4  ;;  %s84_s18 = int_to_ptr.vmem [resolvable:$true] %s83_s18  ;;  %s24_s20 = int_to_ptr.vmem [resolvable:$true] %s23_s20 }
  0x1b   :  { %s644_s1 = scalar_lea.vmem %s84_s18, 512  ;;  %p649_p11 = scmp.lt.s32.totalorder %s84_s18, %s84_s18 }
  0x1c   :  { %p645_p10 = scmp.ne.s32.totalorder %s84_s18, %s644_s1  ;;  %p650_p12 = scmp.lt.s32.totalorder %s644_s1, %s644_s1 }
  0x1e   :  { %p651_p13 = por %p650_p12, %p649_p11 }
  0x20   :  { %p652_p0 = pnand %p651_p13, %p645_p10 }
  0x22   :  { %655 = shalt.err (!%p652_p0)
}
  0x23   :  { %89 = dma.hbm_to_vmem [thread:$0]  %s887_s5, 512, %s84_s18, [#allocation12], %s768_s10, %s768_s10, %s769_s11  }
  0x24   :  { %s664_s3 = scalar_lea.vmem %s24_s20, 256  ;;  %p669_p2 = scmp.lt.s32.totalorder %s24_s20, %s24_s20 }
  0x25   :  { %p665_p1 = scmp.ne.s32.totalorder %s24_s20, %s664_s3  ;;  %p670_p3 = scmp.lt.s32.totalorder %s664_s3, %s664_s3 }
  0x27   :  { %p671_p4 = por %p670_p3, %p669_p2 }
  0x29   :  { %p672_p5 = pnand %p671_p4, %p665_p1 }
  0x2b   :  { %675 = shalt.err (!%p672_p5)
}
  0x2c   :  { %29 = dma.hbm_to_vmem [thread:$0]  %s882_s0, 256, %s24_s20, [#allocation3], %s768_s10, %s768_s10, %s769_s11  }
  0x2d   :  { %s772_s25 = smov [#allocation7]   ;;  %s773_s27 = smov [#allocation10]  }
  0x2e   :  { %s47_s26 = sshll.u32 %s772_s25, 4  ;;  %s71_s28 = sshll.u32 %s773_s27, 4  ;;  %s48_s26 = int_to_ptr.vmem [resolvable:$true] %s47_s26  ;;  %s72_s28 = int_to_ptr.vmem [resolvable:$true] %s71_s28 }
  0x2f   :  { %s684_s5 = scalar_lea.vmem %s48_s26, 256  ;;  %p689_p7 = scmp.lt.s32.totalorder %s48_s26, %s48_s26 }
  0x30   :  { %p685_p6 = scmp.ne.s32.totalorder %s48_s26, %s684_s5  ;;  %p690_p8 = scmp.lt.s32.totalorder %s684_s5, %s684_s5 }
  0x32   :  { %p691_p9 = por %p690_p8, %p689_p7 }
  0x34   :  { %p692_p10 = pnand %p691_p9, %p685_p6 }
  0x36   :  { %695 = shalt.err (!%p692_p10)
}
  0x37   :  { %53 = dma.hbm_to_vmem [thread:$0]  %s884_s2, 256, %s48_s26, [#allocation6], %s768_s10, %s768_s10, %s769_s11  }
  0x38   :  { %s704_s0 = scalar_lea.vmem %s72_s28, 512  ;;  %p709_p12 = scmp.lt.s32.totalorder %s72_s28, %s72_s28 }
  0x39   :  { %p705_p11 = scmp.ne.s32.totalorder %s72_s28, %s704_s0  ;;  %p710_p13 = scmp.lt.s32.totalorder %s704_s0, %s704_s0 }
  0x3b   :  { %p711_p0 = por %p710_p13, %p709_p12 }
  0x3d   :  { %p712_p1 = pnand %p711_p0, %p705_p11 }
  0x3f   :  { %715 = shalt.err (!%p712_p1)
}
  0x40   :  { %77 = dma.hbm_to_vmem [thread:$0]  %s886_s4, 512, %s72_s28, [#allocation9], %s768_s10, %s768_s10, %s769_s11  }
  0x41   :  { %s774_s13 = smov [#allocation13]  }
  0x42   :  { %s95_s14 = sshll.u32 %s774_s13, 4  ;;  %s96_s14 = int_to_ptr.vmem [resolvable:$true] %s95_s14 }
  0x43   :  { %s724_s15 = scalar_lea.vmem %s96_s14, 512  ;;  %p729_p3 = scmp.lt.s32.totalorder %s96_s14, %s96_s14 }
  0x44   :  { %p725_p2 = scmp.ne.s32.totalorder %s96_s14, %s724_s15  ;;  %p730_p4 = scmp.lt.s32.totalorder %s724_s15, %s724_s15 }
  0x46   :  { %p731_p5 = por %p730_p4, %p729_p3 }
  0x48   :  { %p732_p6 = pnand %p731_p5, %p725_p2 }
  0x4a   :  { %735 = shalt.err (!%p732_p6)
}
  0x4b   :  { %101 = dma.hbm_to_vmem [thread:$0]  %s888_s6, 512, %s96_s14, [#allocation12], %s768_s10, %s768_s10, %s769_s11  }
  0x4c   :  { %756 = dma.done.wait [#allocation3], 256  }
  0x4d   :  { %757 = vsyncadd [#allocation3], 4294967040 }
  0x4e   :  { %758 = dma.done.wait [#allocation6], 512  }
  0x4f   :  { %759 = vsyncadd [#allocation6], 4294966784 }
  0x50   :  { %760 = dma.done.wait [#allocation9], 1024  }
  0x51   :  { %761 = vsyncadd [#allocation9], 4294966272 }
  0x52   :  { %762 = dma.done.wait [#allocation12], 1024  }
  0x53   :  { %763 = vsyncadd [#allocation12], 4294966272  ;;  %v136_v0 = vld [vmem:[#allocation10 + $0x18] sm:$0xff]  ;;  %v135_v2 = vld [vmem:[#allocation10 + $0x10] sm:$0xff]  ;;  %vm137_vm0 = vcmask 261120   ;;  %s775_s17 = smov [#allocation14]  }
  0x54   :  { %v130_v1 = vld [vmem:[#allocation8 + $0x18] sm:$0xff]  ;;  %538 = vmatprep.subr.mxu0 %v136_v0  ;;  %v129_v3 = vld [vmem:[#allocation8 + $0x10] sm:$0xff]  ;;  %v134_v4 = vld [vmem:[#allocation10 + $0x8] sm:$0xff]  ;;  %s490_s18 = sshll.u32 %s775_s17, 4  ;;  %s491_s18 = int_to_ptr.vmem [resolvable:$true] %s490_s18 }
  0x55   :  { %549 = vmatprep.subr.mxu1 %v130_v1  ;;  %539 = vmatpush3.msra.mxu0 %v136_v0  ;;  %v128_v5 = vld [vmem:[#allocation8 + $0x8] sm:$0xff]  ;;  %v133_v6 = vld [vmem:[#allocation10] sm:$0xff]  ;;  %v125_v9 = vld [vmem:[#allocation2] sm:$0xff]  ;;  %s736_s19 = scalar_lea.vmem %s491_s18, 256  ;;  %p741_p8 = scmp.lt.s32.totalorder %s491_s18, %s491_s18 }
  0x56   :  { %550 = vmatpush3.msra.mxu1 %v130_v1  ;;  %540 = vmatprep.subr.mxu0 %v135_v2  ;;  %v127_v7 = vld [vmem:[#allocation8] sm:$0xff]  ;;  %v132_v10 = vld [vmem:[#allocation5 + $0x8] sm:$0xff]  ;;  %v126_v11 = vld [vmem:[#allocation2 + $0x8] sm:$0xff]  ;;  %p737_p7 = scmp.ne.s32.totalorder %s491_s18, %s736_s19  ;;  %p742_p9 = scmp.lt.s32.totalorder %s736_s19, %s736_s19 }
  0x57   :  { %551 = vmatprep.subr.mxu1 %v129_v3  ;;  %541 = vmatpush3.msra.mxu0 %v135_v2  ;;  %v131_v8 = vld [vmem:[#allocation5] sm:$0xff]  ;;  %v305_v12 = vld [vmem:[#allocation11 + $0x18] sm:$0xff]  ;;  %v300_v13 = vld [vmem:[#allocation7] sm:$0xff] }
  0x58   :  { %552 = vmatpush3.msra.mxu1 %v129_v3  ;;  %542 = vmatprep.subr.mxu0 %v134_v4  ;;  %v304_v14 = vld [vmem:[#allocation11 + $0x10] sm:$0xff]  ;;  %v303_v15 = vld [vmem:[#allocation11 + $0x8] sm:$0xff]  ;;  %v302_v16 = vld [vmem:[#allocation11] sm:$0xff]  ;;  %p743_p10 = por %p742_p9, %p741_p8 }
  0x59   :  { %553 = vmatprep.subr.mxu1 %v128_v5  ;;  %543 = vmatpush3.msra.mxu0 %v134_v4  ;;  %v301_v17 = vld [vmem:[#allocation7 + $0x8] sm:$0xff]  ;;  %v391_v19 = vld [vmem:[#allocation13 + $0x10] sm:$0xff]  ;;  %v390_v20 = vld [vmem:[#allocation13 + $0x8] sm:$0xff] }
  0x5a   :  { %554 = vmatpush3.msra.mxu1 %v128_v5  ;;  %544 = vmatprep.subr.mxu0 %v133_v6  ;;  %v392_v18 = vld [vmem:[#allocation13 + $0x18] sm:$0xff]  ;;  %v389_v21 = vld [vmem:[#allocation13] sm:$0xff]  ;;  %v511_v32 = vld [vmem:[%s889_s7] ss:$0 sm:$0xff]  ;;  %p744_p11 = pnand %p743_p10, %p737_p7 }
  0x5b   :  { %555 = vmatprep.subr.mxu1 %v127_v7  ;;  %545 = vmatpush3.msra.mxu0 %v133_v6 }
  0x5c   :  { %546 = vmatprep.mubr.msk.f32.mxu0 %vm137_vm0, %v131_v8  ;;  %556 = vmatpush3.msra.mxu1 %v127_v7 }
  0x5d   :  { %557 = vmatprep.mubr.msk.f32.mxu1 %vm137_vm0, %v125_v9  ;;  %547 = vmatmul.mubr.msk.f32.vlgmr.msra.gmra.mxu0 %vm137_vm0, %v132_v10 }
  0x5e   :  { %558 = vmatmul.mubr.msk.f32.vlgmr.msra.gmra.mxu1 %vm137_vm0, %v126_v11  ;;  %560 = vmatprep.subr.mxu0 %v305_v12 }
  0x5f   :  { %568 = vmatprep.mubr.msk.f32.mxu0 %vm137_vm0, %v300_v13  ;;  %561 = vmatpush3.msra.mxu0 %v305_v12 }
  0x60   :  { %562 = vmatprep.subr.mxu0 %v304_v14  ;;  %571 = vmatprep.subr.mxu1 %v392_v18 }
  0x61   :  { %563 = vmatpush3.msra.mxu0 %v304_v14  ;;  %572 = vmatpush3.msra.mxu1 %v392_v18 }
  0x62   :  { %564 = vmatprep.subr.mxu0 %v303_v15  ;;  %573 = vmatprep.subr.mxu1 %v391_v19 }
  0x63   :  { %565 = vmatpush3.msra.mxu0 %v303_v15  ;;  %574 = vmatpush3.msra.mxu1 %v391_v19 }
  0x64   :  { %566 = vmatprep.subr.mxu0 %v302_v16  ;;  %575 = vmatprep.subr.mxu1 %v390_v20 }
  0x65   :  { %567 = vmatpush3.msra.mxu0 %v302_v16  ;;  %576 = vmatpush3.msra.mxu1 %v390_v20 }
  0x66   :  { %569 = vmatmul.mubr.msk.f32.vlgmr.msra.gmra.mxu0 %vm137_vm0, %v301_v17  ;;  %577 = vmatprep.subr.mxu1 %v389_v21 }
  0x67   :  { %578 = vmatpush3.msra.mxu1 %v389_v21 }
 0x11d   :  { %v548_v22 = vpop.f32.mrf.mxu0 }
 0x11e   :  { %v559_v23 = vpop.f32.mrf.mxu1 }
 0x11f   :  { %v210_v24 = vpop.f32.mrf.mxu0  ;;  %v297_v28 = vadd.f32 %v559_v23, %v548_v22 }
 0x120   :  { %v291_v25 = vpop.f32.mrf.mxu1 }
 0x121   :  { %v292_v27 = vadd.f32 %v291_v25, %v210_v24 }
 0x126   :  { %v570_v26 = vpop.f32.mrf.mxu0 }
 0x127   :  { %v388_v31 = vadd.f32 %v570_v26, %v297_v28 }
 0x128   :  { %v378_v29 = vpop.f32.mrf.mxu0 }
 0x129   :  { %v387_v30 = vadd.f32 %v378_v29, %v292_v27 }
 0x12b   :  { %579 = vmatprep.mubr.msk.f32.mxu1 %vm137_vm0, %v387_v30 }
 0x12c   :  { %580 = vmatmul.mubr.msk.f32.vlgmr.msra.gmra.mxu1 %vm137_vm0, %v388_v31 }
 0x1ec   :  { %v581_v33 = vpop.f32.mrf.mxu1 }
 0x1ed   :  { %v478_v34 = vadd.f32 %v581_v33, %v511_v32 }
 0x1ee   :  { %v472_v35 = vpop.f32.mrf.mxu1 }
 0x1ef   :  { %592 = vtanh.f32 %v478_v34  ;;  %v473_v36 = vadd.f32 %v511_v32, %v472_v35 }
 0x1f1   :  { %594 = vtanh.f32 %v473_v36 }
 0x1fc   :  { %v593_v37 = vpop.eup %592 }
 0x1fd   :  { %484 = vst.msk [vmem:[#allocation14 + $0x8] sm:$0xff] %vm137_vm0, %v593_v37 }
 0x1fe   :  { %v595_v38 = vpop.eup %594 }
 0x1ff   :  { %483 = vst.msk [vmem:[#allocation14] sm:$0xff] %vm137_vm0, %v595_v38 }
 0x200   :  { %747 = shalt.err (!%p744_p11)
}
 0x201   :  { %496 = dma.vmem_to_hbm [thread:$0]  %s491_s18, 256, %s890_s8, [#allocation4], %s768_s10, %s768_s10, %s769_s11  }
 0x202   :  { %764 = dma.done.wait [#allocation4], 256  }
 0x203   :  { %765 = vsyncadd [#allocation4], 4294967040 }
 0x204   :  { %500 = vsyncpa [#allocation3], 1 }
 0x205   :  { %501 = vsyncpa [#allocation6], 1 }
 0x206   :  { %502 = vsyncpa [#allocation9], 1 }
 0x207   :  { %503 = vsyncpa [#allocation12], 1 }
 0x208   :  { %504 = vsyncpa [#allocation4], 1 }

</bundles_post_ra>
